<compile_context>
chip_gen: v7x
topology: tpu7x:2x2x1
jax: 0.10.0
libtpu: 0.0.40
codegen_flags: <defaults>
</compile_context>

<pallas_src>
import math
import functools

import jax
import jax.numpy as jnp
from jax import lax
from jax.experimental import pallas as pl
from jax.experimental.pallas import tpu as pltpu


# ---------------------------------------------------------------------------
# helpers
# ---------------------------------------------------------------------------
def _choose_tile(t, target):
    """Sequence tile: t itself if t < 128 (full-dim block), otherwise the
    largest multiple-of-128 divisor of t that is <= target (keeps lane /
    bf16-sublane layouts dense and avoids the tiny-tile perf cliff)."""
    if t < 128:
        return t
    if t <= target and t % 128 == 0:
        return t
    if t % 128 == 0:
        for cand in range(target, 0, -128):
            if t % cand == 0:
                return cand
    # TODO(synk): pad T to a multiple of 128 for awkward sequence lengths.
    raise ValueError(f"sequence length {t} must be < 128 or a multiple of 128")


def _vmem_limit(est_bytes):
    """Generation-aware VMEM budget: cap at ~75% of physical VMEM so the
    compiler keeps headroom for internal scratch (v7x: 64 MiB physical)."""
    try:
        phys = int(pltpu.get_tpu_info().vmem_capacity_bytes)
    except Exception:
        phys = 128 * 1024 * 1024
    cap = (3 * phys) // 4
    return int(min(cap, max(32 * 1024 * 1024, 2 * est_bytes)))


# ---------------------------------------------------------------------------
# Kernel 1: fused QKV projection, head-split (B, H, T, hd) bf16 outputs
# ---------------------------------------------------------------------------
def _qkv_proj_kernel(x_ref, w_ref, b_ref, q_ref, k_ref, v_ref, *, n_head, hd):
    x = x_ref[0].astype(jnp.bfloat16)                                   # (RT, C)
    acc = jnp.dot(x, w_ref[...], preferred_element_type=jnp.float32)    # (RT, 3C)
    acc = acc + b_ref[...]
    c = n_head * hd
    # Head-split relayout happens here, once per row tile (instead of an XLA
    # transpose of the whole (B, T, 3C) activation through HBM).
    for h in range(n_head):
        lo = h * hd
        q_ref[0, h] = acc[:, lo:lo + hd].astype(q_ref.dtype)
        k_ref[0, h] = acc[:, c + lo:c + lo + hd].astype(k_ref.dtype)
        v_ref[0, h] = acc[:, 2 * c + lo:2 * c + lo + hd].astype(v_ref.dtype)


def _qkv_projection(x, w_qkv, b_qkv, rt, n_head, hd):
    B, T, C = x.shape
    C3 = w_qkv.shape[1]
    kernel = functools.partial(_qkv_proj_kernel, n_head=n_head, hd=hd)
    est = (2 * rt * C * 4                      # x tile (double-buffered, f32)
           + 2 * C * C3 * 2 + C3 * 4           # packed weight (bf16) / bias
           + 3 * 2 * n_head * rt * hd * 2      # q/k/v tiles (double-buffered)
           + rt * C3 * 4)                      # f32 accumulator intermediate
    out_sds = jax.ShapeDtypeStruct((B, n_head, T, hd), jnp.bfloat16)
    return pl.pallas_call(
        kernel,
        out_shape=(out_sds, out_sds, out_sds),
        grid_spec=pltpu.PrefetchScalarGridSpec(
            num_scalar_prefetch=0,
            grid=(B, T // rt),
            in_specs=[
                pl.BlockSpec((1, rt, C), lambda b, i: (b, i, 0)),   # x tile
                # TODO(synk): tile the (C, 3C) weight along its N dim for very
                # large C so it stays within v7x's 64 MiB VMEM.
                pl.BlockSpec((C, C3), lambda b, i: (0, 0)),         # packed W (bf16)
                pl.BlockSpec((1, C3), lambda b, i: (0, 0)),         # packed bias (f32)
            ],
            out_specs=[
                pl.BlockSpec((1, n_head, rt, hd), lambda b, i: (b, 0, i, 0)),
                pl.BlockSpec((1, n_head, rt, hd), lambda b, i: (b, 0, i, 0)),
                pl.BlockSpec((1, n_head, rt, hd), lambda b, i: (b, 0, i, 0)),
            ],
        ),
        compiler_params=pltpu.CompilerParams(
            dimension_semantics=("parallel", "parallel"),
            vmem_limit_bytes=_vmem_limit(est),
        ),
    )(x, w_qkv, b_qkv)


# ---------------------------------------------------------------------------
# Kernel 2: flash attention over a lower-triangle schedule + fused out-proj
# ---------------------------------------------------------------------------
def _flash_attn_proj_kernel(qi_tab, ki_tab, q_ref, k_ref, v_ref, wp_ref, bp_ref,
                            o_ref, m_sc, l_sc, acc_sc, *, ts, n_head):
    t = pl.program_id(1)
    qi = qi_tab[t]
    ki = ki_tab[t]
    c = wp_ref.shape[2]

    @pl.when(ki == 0)
    def _init():
        m_sc[...] = jnp.full(m_sc.shape, -jnp.inf, dtype=m_sc.dtype)
        l_sc[...] = jnp.zeros(l_sc.shape, dtype=l_sc.dtype)
        acc_sc[...] = jnp.zeros(acc_sc.shape, dtype=acc_sc.dtype)

    def _online_softmax_update(s):
        # s: (H, TS, TS) f32 scores (1/sqrt(hd) already folded into Q).
        m_prev = m_sc[...]                                               # (H, TS, 1)
        m_new = jnp.maximum(m_prev, jnp.max(s, axis=-1, keepdims=True))
        alpha = jnp.exp(m_prev - m_new)                                  # f32
        p = jnp.exp(s - m_new)                                           # f32 softmax math
        l_sc[...] = alpha * l_sc[...] + jnp.sum(p, axis=-1, keepdims=True)
        acc_sc[...] = alpha * acc_sc[...] + jnp.einsum(
            "hqk,hkd->hqd", p.astype(jnp.bfloat16), v_ref[0],
            preferred_element_type=jnp.float32)
        m_sc[...] = m_new

    # Strictly-below-diagonal KV tiles: fully unmasked -> no iota/compare/select.
    @pl.when(ki < qi)
    def _interior():
        s = jnp.einsum("hqd,hkd->hqk", q_ref[0], k_ref[0],
                       preferred_element_type=jnp.float32)               # (H, TS, TS)
        _online_softmax_update(s)

    # Diagonal KV tile: apply the causal mask, update, then finalize
    # (normalize + fused output projection -> one lane-dense (TS, C) store).
    @pl.when(ki == qi)
    def _diag():
        s = jnp.einsum("hqd,hkd->hqk", q_ref[0], k_ref[0],
                       preferred_element_type=jnp.float32)
        row = lax.broadcasted_iota(jnp.int32, (ts, ts), 0)
        col = lax.broadcasted_iota(jnp.int32, (ts, ts), 1)
        s = jnp.where((row >= col)[None, :, :], s, -jnp.inf)
        _online_softmax_update(s)

        inv_l = pl.reciprocal(l_sc[...], approx=True)                    # EUP slot
        y = (acc_sc[...] * inv_l).astype(jnp.bfloat16)                   # (H, TS, hd)
        out = jnp.broadcast_to(bp_ref[...], (ts, c))                     # (TS, C) f32
        # Projection as a sum over per-head (hd, C) weight slabs (== concat(y) @ Wp).
        # TODO(synk): for very large C, tile Wp / un-fuse the projection (v7x VMEM).
        for h in range(n_head):
            out = out + jnp.dot(y[h], wp_ref[h],
                                preferred_element_type=jnp.float32)
        o_ref[0] = out.astype(o_ref.dtype)


def causal_self_attention(x, params, n_head):
    """x: (B, T, C) float32.  params: dict of weights/biases.  Returns (B, T, C)."""
    B, T, C = x.shape
    assert C % n_head == 0
    hd = C // n_head
    scale = 1.0 / math.sqrt(hd)

    # Attention sequence tile: 128 is safe / optimal on v5e and safe on v6e/v7x.
    # (On v6e/v7x a 256 q-tile would better fill the 256x256 MXU; raise `target`
    #  there once generation detection is wired in.)
    ts = _choose_tile(T, target=128)
    n_s = T // ts
    # QKV projection is memory / step-overhead bound: give it a larger row tile.
    rt = _choose_tile(T, target=512)

    # --- wrapper-side packing (pure XLA, outside kernels) -------------------
    # Fold the 1/sqrt(hd) softmax scale into the Q weight/bias columns.
    w_qkv = jnp.concatenate(
        [params["wq"] * scale, params["wk"], params["wv"]],
        axis=1).astype(jnp.bfloat16)                                     # (C, 3C)
    b_qkv = jnp.concatenate(
        [params["bq"] * scale, params["bk"], params["bv"]], axis=1)      # (1, 3C) f32
    wp = params["wp"].reshape(n_head, hd, C).astype(jnp.bfloat16)        # (H, hd, C)
    bp = params["bp"]                                                    # (1, C) f32

    # 1) fused QKV projection -> q, k, v already in (B, H, T, hd) bf16 layout.
    q, k, v = _qkv_projection(x, w_qkv, b_qkv, rt, n_head, hd)

    # 2) flash attention over a flattened lower-triangle (qi, ki<=qi) schedule:
    #    no dead grid steps above the causal diagonal.
    qi_list, ki_list = [], []
    for qi in range(n_s):
        for ki in range(qi + 1):
            qi_list.append(qi)
            ki_list.append(ki)
    qi_tab = jnp.asarray(qi_list, dtype=jnp.int32)
    ki_tab = jnp.asarray(ki_list, dtype=jnp.int32)
    n_tri = len(qi_list)

    kernel = functools.partial(_flash_attn_proj_kernel, ts=ts, n_head=n_head)

    est = (3 * 2 * n_head * ts * hd * 2          # q/k/v tiles (double-buffered, bf16)
           + 2 * n_head * hd * C * 2 + C * 4     # wp / bp
           + 2 * ts * C * 4                      # output tile (double-buffered, f32)
           + n_head * ts * (hd + 2) * 4          # scratch (m, l, acc)
           + n_head * ts * ts * 4)               # score intermediate headroom

    return pl.pallas_call(
        kernel,
        out_shape=jax.ShapeDtypeStruct((B, T, C), x.dtype),
        grid_spec=pltpu.PrefetchScalarGridSpec(
            num_scalar_prefetch=2,               # qi_tab, ki_tab (SMEM)
            grid=(B, n_tri),                     # (batch, lower-triangle step)
            in_specs=[
                pl.BlockSpec((1, n_head, ts, hd),
                             lambda b, t, qt, kt: (b, 0, qt[t], 0)),      # Q tile
                pl.BlockSpec((1, n_head, ts, hd),
                             lambda b, t, qt, kt: (b, 0, kt[t], 0)),      # K tile
                pl.BlockSpec((1, n_head, ts, hd),
                             lambda b, t, qt, kt: (b, 0, kt[t], 0)),      # V tile
                pl.BlockSpec((n_head, hd, C), lambda b, t, qt, kt: (0, 0, 0)),  # Wp
                pl.BlockSpec((1, C), lambda b, t, qt, kt: (0, 0)),              # bp
            ],
            out_specs=pl.BlockSpec((1, ts, C),
                                   lambda b, t, qt, kt: (b, qt[t], 0)),
            scratch_shapes=[
                pltpu.VMEM((n_head, ts, 1), jnp.float32),    # running max
                pltpu.VMEM((n_head, ts, 1), jnp.float32),    # running denom
                pltpu.VMEM((n_head, ts, hd), jnp.float32),   # accumulator
            ],
        ),
        compiler_params=pltpu.CompilerParams(
            # Batch axis "parallel": balanced split across v7x's two TensorCores
            # even under causal skipping; triangle axis "arbitrary" (carries the
            # VMEM-resident online-softmax state and the output residency).
            dimension_semantics=("parallel", "arbitrary"),
            vmem_limit_bytes=_vmem_limit(est),
        ),
    )(qi_tab, ki_tab, q, k, v, wp, bp)


# ---------------------------------------------------------------------------
# Pure-JAX reference (matches the PyTorch forward; dropout = identity)
# ---------------------------------------------------------------------------
def reference_attention(x, params, n_head):
    B, T, C = x.shape
    hd = C // n_head
    scale = 1.0 / math.sqrt(hd)

    def lin(z, w, b):
        return z @ w + b[0]

    q = lin(x, params["wq"], params["bq"]).reshape(B, T, n_head, hd).transpose(0, 2, 1, 3)
    k = lin(x, params["wk"], params["bk"]).reshape(B, T, n_head, hd).transpose(0, 2, 1, 3)
    v = lin(x, params["wv"], params["bv"]).reshape(B, T, n_head, hd).transpose(0, 2, 1, 3)

    att = jnp.einsum("bhqd,bhkd->bhqk", q, k) * scale
    mask = jnp.tril(jnp.ones((T, T), dtype=bool))
    att = jnp.where(mask[None, None], att, -jnp.inf)
    att = jax.nn.softmax(att, axis=-1)
    y = jnp.einsum("bhqk,bhkd->bhqd", att, v)
    y = y.transpose(0, 2, 1, 3).reshape(B, T, C)
    return lin(y, params["wp"], params["bp"])


def init_params(key, n_embd):
    """Deterministic synthetic params; weights stored as [C_in, C_out]."""
    keys = jax.random.split(key, 8)
    s = 0.02
    return {
        "wq": s * jax.random.normal(keys[0], (n_embd, n_embd), jnp.float32),
        "bq": s * jax.random.normal(keys[1], (1, n_embd), jnp.float32),
        "wk": s * jax.random.normal(keys[2], (n_embd, n_embd), jnp.float32),
        "bk": s * jax.random.normal(keys[3], (1, n_embd), jnp.float32),
        "wv": s * jax.random.normal(keys[4], (n_embd, n_embd), jnp.float32),
        "bv": s * jax.random.normal(keys[5], (1, n_embd), jnp.float32),
        "wp": s * jax.random.normal(keys[6], (n_embd, n_embd), jnp.float32),
        "bp": s * jax.random.normal(keys[7], (1, n_embd), jnp.float32),
    }


def _run_case(key, B, T, C, n_head):
    kx, kp = jax.random.split(key)
    x = jax.random.normal(kx, (B, T, C), jnp.float32)
    params = init_params(kp, C)

    out = jax.block_until_ready(causal_self_attention(x, params, n_head))
    ref = reference_attention(x, params, n_head)

    assert out.shape == (B, T, C)
    # bf16 MXU inputs + approx reciprocal -> compare with a generous tolerance.
    assert bool(jnp.allclose(out, ref, atol=2e-2, rtol=2e-2)), "mismatch vs reference"


if __name__ == "__main__":
    key = jax.random.PRNGKey(0)
    k1, k2 = jax.random.split(key)

    # Small config: batch=2, seq=8, n_embd=32, n_head=4 (head_dim=8); single tile.
    _run_case(k1, B=2, T=8, C=32, n_head=4)

    # Larger config exercising sequence tiling, the lower-triangle schedule
    # (3 steps per batch element for 2x2 tiles), online softmax across KV tiles
    # and diagonal-only masking: seq=256, n_embd=128, n_head=2.
    _run_case(k2, B=2, T=256, C=128, n_head=2)

    print("KERNEL_OK")
</pallas_src>

<mosaic_0001>
module attributes {stable_mosaic.version = 11 : i64} {
  func.func @_qkv_proj_kernel(%arg0: i32, %arg1: i32, %arg2: memref<1x8x32xf32, #tpu.memory_space<vmem>>, %arg3: memref<32x96xbf16, #tpu.memory_space<vmem>>, %arg4: memref<1x96xf32, #tpu.memory_space<vmem>>, %arg5: memref<1x4x8x8xbf16, #tpu.memory_space<vmem>>, %arg6: memref<1x4x8x8xbf16, #tpu.memory_space<vmem>>, %arg7: memref<1x4x8x8xbf16, #tpu.memory_space<vmem>>) attributes {dimension_semantics = [#tpu.dimension_semantics<parallel>, #tpu.dimension_semantics<parallel>], iteration_bounds = array<i64: 2, 1>, scalar_prefetch = 0 : i64, scratch_operands = 0 : i64, tpu.core_type = #tpu.core_type<tc>, window_params = [{transform_indices = @transform_0, window_bounds = array<i64: 1, 8, 32>}, {pipeline_mode = #tpu.pipeline_mode<synchronous>, transform_indices = @transform_1, window_bounds = array<i64: 32, 96>}, {pipeline_mode = #tpu.pipeline_mode<synchronous>, transform_indices = @transform_2, window_bounds = array<i64: 1, 96>}, {transform_indices = @transform_3, window_bounds = array<i64: 1, 4, 8, 8>}, {transform_indices = @transform_4, window_bounds = array<i64: 1, 4, 8, 8>}, {transform_indices = @transform_5, window_bounds = array<i64: 1, 4, 8, 8>}]} {
    %c0 = arith.constant 0 : index
    %c0_0 = arith.constant 0 : index
    %c0_1 = arith.constant 0 : index
    %0 = vector.load %arg2[%c0, %c0_0, %c0_1] : memref<1x8x32xf32, #tpu.memory_space<vmem>>, vector<1x8x32xf32>
    %1 = vector.shape_cast %0 : vector<1x8x32xf32> to vector<8x32xf32>
    %2 = arith.truncf %1 : vector<8x32xf32> to vector<8x32xbf16>
    %c0_2 = arith.constant 0 : index
    %c0_3 = arith.constant 0 : index
    %3 = vector.load %arg3[%c0_2, %c0_3] : memref<32x96xbf16, #tpu.memory_space<vmem>>, vector<32x96xbf16>
    %cst = arith.constant dense<0.000000e+00> : vector<8x96xf32>
    %4 = tpu.matmul %2, %3, %cst {dimension_numbers = #tpu.dot_dimension_numbers<[1], [0], [0], [1], [0, 0, 1, 1], [], []>} : vector<8x32xbf16>, vector<32x96xbf16>, vector<8x96xf32> -> vector<8x96xf32>
    %c0_4 = arith.constant 0 : index
    %c0_5 = arith.constant 0 : index
    %5 = vector.load %arg4[%c0_4, %c0_5] : memref<1x96xf32, #tpu.memory_space<vmem>>, vector<1x96xf32>
    %6 = vector.broadcast %5 : vector<1x96xf32> to vector<8x96xf32>
    %7 = arith.addf %4, %6 : vector<8x96xf32>
    %8 = vector.extract_strided_slice %7 {offsets = [0, 0], sizes = [8, 8], strides = [1, 1]} : vector<8x96xf32> to vector<8x8xf32>
    %9 = arith.truncf %8 : vector<8x8xf32> to vector<8x8xbf16>
    %c0_6 = arith.constant 0 : index
    %c0_7 = arith.constant 0 : index
    %c0_8 = arith.constant 0 : index
    %c0_9 = arith.constant 0 : index
    %10 = vector.load %arg5[%c0_6, %c0_7, %c0_8, %c0_9] : memref<1x4x8x8xbf16, #tpu.memory_space<vmem>>, vector<1x1x8x8xbf16>
    %11 = vector.shape_cast %10 : vector<1x1x8x8xbf16> to vector<8x8xbf16>
    %12 = vector.shape_cast %9 : vector<8x8xbf16> to vector<1x1x8x8xbf16>
    tpu.vector_store %arg5[%c0_6, %c0_7, %c0_8, %c0_9], %12 {strides = array<i32>} : memref<1x4x8x8xbf16, #tpu.memory_space<vmem>>, vector<1x1x8x8xbf16>,
    %13 = vector.extract_strided_slice %7 {offsets = [0, 32], sizes = [8, 8], strides = [1, 1]} : vector<8x96xf32> to vector<8x8xf32>
    %14 = arith.truncf %13 : vector<8x8xf32> to vector<8x8xbf16>
    %c0_10 = arith.constant 0 : index
    %c0_11 = arith.constant 0 : index
    %c0_12 = arith.constant 0 : index
    %c0_13 = arith.constant 0 : index
    %15 = vector.load %arg6[%c0_10, %c0_11, %c0_12, %c0_13] : memref<1x4x8x8xbf16, #tpu.memory_space<vmem>>, vector<1x1x8x8xbf16>
    %16 = vector.shape_cast %15 : vector<1x1x8x8xbf16> to vector<8x8xbf16>
    %17 = vector.shape_cast %14 : vector<8x8xbf16> to vector<1x1x8x8xbf16>
    tpu.vector_store %arg6[%c0_10, %c0_11, %c0_12, %c0_13], %17 {strides = array<i32>} : memref<1x4x8x8xbf16, #tpu.memory_space<vmem>>, vector<1x1x8x8xbf16>,
    %18 = vector.extract_strided_slice %7 {offsets = [0, 64], sizes = [8, 8], strides = [1, 1]} : vector<8x96xf32> to vector<8x8xf32>
    %19 = arith.truncf %18 : vector<8x8xf32> to vector<8x8xbf16>
    %c0_14 = arith.constant 0 : index
    %c0_15 = arith.constant 0 : index
    %c0_16 = arith.constant 0 : index
    %c0_17 = arith.constant 0 : index
    %20 = vector.load %arg7[%c0_14, %c0_15, %c0_16, %c0_17] : memref<1x4x8x8xbf16, #tpu.memory_space<vmem>>, vector<1x1x8x8xbf16>
    %21 = vector.shape_cast %20 : vector<1x1x8x8xbf16> to vector<8x8xbf16>
    %22 = vector.shape_cast %19 : vector<8x8xbf16> to vector<1x1x8x8xbf16>
    tpu.vector_store %arg7[%c0_14, %c0_15, %c0_16, %c0_17], %22 {strides = array<i32>} : memref<1x4x8x8xbf16, #tpu.memory_space<vmem>>, vector<1x1x8x8xbf16>,
    %23 = vector.extract_strided_slice %7 {offsets = [0, 8], sizes = [8, 8], strides = [1, 1]} : vector<8x96xf32> to vector<8x8xf32>
    %24 = arith.truncf %23 : vector<8x8xf32> to vector<8x8xbf16>
    %c0_18 = arith.constant 0 : index
    %c1 = arith.constant 1 : index
    %c0_19 = arith.constant 0 : index
    %c0_20 = arith.constant 0 : index
    %25 = vector.load %arg5[%c0_18, %c1, %c0_19, %c0_20] : memref<1x4x8x8xbf16, #tpu.memory_space<vmem>>, vector<1x1x8x8xbf16>
    %26 = vector.shape_cast %25 : vector<1x1x8x8xbf16> to vector<8x8xbf16>
    %27 = vector.shape_cast %24 : vector<8x8xbf16> to vector<1x1x8x8xbf16>
    tpu.vector_store %arg5[%c0_18, %c1, %c0_19, %c0_20], %27 {strides = array<i32>} : memref<1x4x8x8xbf16, #tpu.memory_space<vmem>>, vector<1x1x8x8xbf16>,
    %28 = vector.extract_strided_slice %7 {offsets = [0, 40], sizes = [8, 8], strides = [1, 1]} : vector<8x96xf32> to vector<8x8xf32>
    %29 = arith.truncf %28 : vector<8x8xf32> to vector<8x8xbf16>
    %c0_21 = arith.constant 0 : index
    %c1_22 = arith.constant 1 : index
    %c0_23 = arith.constant 0 : index
    %c0_24 = arith.constant 0 : index
    %30 = vector.load %arg6[%c0_21, %c1_22, %c0_23, %c0_24] : memref<1x4x8x8xbf16, #tpu.memory_space<vmem>>, vector<1x1x8x8xbf16>
    %31 = vector.shape_cast %30 : vector<1x1x8x8xbf16> to vector<8x8xbf16>
    %32 = vector.shape_cast %29 : vector<8x8xbf16> to vector<1x1x8x8xbf16>
    tpu.vector_store %arg6[%c0_21, %c1_22, %c0_23, %c0_24], %32 {strides = array<i32>} : memref<1x4x8x8xbf16, #tpu.memory_space<vmem>>, vector<1x1x8x8xbf16>,
    %33 = vector.extract_strided_slice %7 {offsets = [0, 72], sizes = [8, 8], strides = [1, 1]} : vector<8x96xf32> to vector<8x8xf32>
    %34 = arith.truncf %33 : vector<8x8xf32> to vector<8x8xbf16>
    %c0_25 = arith.constant 0 : index
    %c1_26 = arith.constant 1 : index
    %c0_27 = arith.constant 0 : index
    %c0_28 = arith.constant 0 : index
    %35 = vector.load %arg7[%c0_25, %c1_26, %c0_27, %c0_28] : memref<1x4x8x8xbf16, #tpu.memory_space<vmem>>, vector<1x1x8x8xbf16>
    %36 = vector.shape_cast %35 : vector<1x1x8x8xbf16> to vector<8x8xbf16>
    %37 = vector.shape_cast %34 : vector<8x8xbf16> to vector<1x1x8x8xbf16>
    tpu.vector_store %arg7[%c0_25, %c1_26, %c0_27, %c0_28], %37 {strides = array<i32>} : memref<1x4x8x8xbf16, #tpu.memory_space<vmem>>, vector<1x1x8x8xbf16>,
    %38 = vector.extract_strided_slice %7 {offsets = [0, 16], sizes = [8, 8], strides = [1, 1]} : vector<8x96xf32> to vector<8x8xf32>
    %39 = arith.truncf %38 : vector<8x8xf32> to vector<8x8xbf16>
    %c0_29 = arith.constant 0 : index
    %c2 = arith.constant 2 : index
    %c0_30 = arith.constant 0 : index
    %c0_31 = arith.constant 0 : index
    %40 = vector.load %arg5[%c0_29, %c2, %c0_30, %c0_31] : memref<1x4x8x8xbf16, #tpu.memory_space<vmem>>, vector<1x1x8x8xbf16>
    %41 = vector.shape_cast %40 : vector<1x1x8x8xbf16> to vector<8x8xbf16>
    %42 = vector.shape_cast %39 : vector<8x8xbf16> to vector<1x1x8x8xbf16>
    tpu.vector_store %arg5[%c0_29, %c2, %c0_30, %c0_31], %42 {strides = array<i32>} : memref<1x4x8x8xbf16, #tpu.memory_space<vmem>>, vector<1x1x8x8xbf16>,
    %43 = vector.extract_strided_slice %7 {offsets = [0, 48], sizes = [8, 8], strides = [1, 1]} : vector<8x96xf32> to vector<8x8xf32>
    %44 = arith.truncf %43 : vector<8x8xf32> to vector<8x8xbf16>
    %c0_32 = arith.constant 0 : index
    %c2_33 = arith.constant 2 : index
    %c0_34 = arith.constant 0 : index
    %c0_35 = arith.constant 0 : index
    %45 = vector.load %arg6[%c0_32, %c2_33, %c0_34, %c0_35] : memref<1x4x8x8xbf16, #tpu.memory_space<vmem>>, vector<1x1x8x8xbf16>
    %46 = vector.shape_cast %45 : vector<1x1x8x8xbf16> to vector<8x8xbf16>
    %47 = vector.shape_cast %44 : vector<8x8xbf16> to vector<1x1x8x8xbf16>
    tpu.vector_store %arg6[%c0_32, %c2_33, %c0_34, %c0_35], %47 {strides = array<i32>} : memref<1x4x8x8xbf16, #tpu.memory_space<vmem>>, vector<1x1x8x8xbf16>,
    %48 = vector.extract_strided_slice %7 {offsets = [0, 80], sizes = [8, 8], strides = [1, 1]} : vector<8x96xf32> to vector<8x8xf32>
    %49 = arith.truncf %48 : vector<8x8xf32> to vector<8x8xbf16>
    %c0_36 = arith.constant 0 : index
    %c2_37 = arith.constant 2 : index
    %c0_38 = arith.constant 0 : index
    %c0_39 = arith.constant 0 : index
    %50 = vector.load %arg7[%c0_36, %c2_37, %c0_38, %c0_39] : memref<1x4x8x8xbf16, #tpu.memory_space<vmem>>, vector<1x1x8x8xbf16>
    %51 = vector.shape_cast %50 : vector<1x1x8x8xbf16> to vector<8x8xbf16>
    %52 = vector.shape_cast %49 : vector<8x8xbf16> to vector<1x1x8x8xbf16>
    tpu.vector_store %arg7[%c0_36, %c2_37, %c0_38, %c0_39], %52 {strides = array<i32>} : memref<1x4x8x8xbf16, #tpu.memory_space<vmem>>, vector<1x1x8x8xbf16>,
    %53 = vector.extract_strided_slice %7 {offsets = [0, 24], sizes = [8, 8], strides = [1, 1]} : vector<8x96xf32> to vector<8x8xf32>
    %54 = arith.truncf %53 : vector<8x8xf32> to vector<8x8xbf16>
    %c0_40 = arith.constant 0 : index
    %c3 = arith.constant 3 : index
    %c0_41 = arith.constant 0 : index
    %c0_42 = arith.constant 0 : index
    %55 = vector.load %arg5[%c0_40, %c3, %c0_41, %c0_42] : memref<1x4x8x8xbf16, #tpu.memory_space<vmem>>, vector<1x1x8x8xbf16>
    %56 = vector.shape_cast %55 : vector<1x1x8x8xbf16> to vector<8x8xbf16>
    %57 = vector.shape_cast %54 : vector<8x8xbf16> to vector<1x1x8x8xbf16>
    tpu.vector_store %arg5[%c0_40, %c3, %c0_41, %c0_42], %57 {strides = array<i32>} : memref<1x4x8x8xbf16, #tpu.memory_space<vmem>>, vector<1x1x8x8xbf16>,
    %58 = vector.extract_strided_slice %7 {offsets = [0, 56], sizes = [8, 8], strides = [1, 1]} : vector<8x96xf32> to vector<8x8xf32>
    %59 = arith.truncf %58 : vector<8x8xf32> to vector<8x8xbf16>
    %c0_43 = arith.constant 0 : index
    %c3_44 = arith.constant 3 : index
    %c0_45 = arith.constant 0 : index
    %c0_46 = arith.constant 0 : index
    %60 = vector.load %arg6[%c0_43, %c3_44, %c0_45, %c0_46] : memref<1x4x8x8xbf16, #tpu.memory_space<vmem>>, vector<1x1x8x8xbf16>
    %61 = vector.shape_cast %60 : vector<1x1x8x8xbf16> to vector<8x8xbf16>
    %62 = vector.shape_cast %59 : vector<8x8xbf16> to vector<1x1x8x8xbf16>
    tpu.vector_store %arg6[%c0_43, %c3_44, %c0_45, %c0_46], %62 {strides = array<i32>} : memref<1x4x8x8xbf16, #tpu.memory_space<vmem>>, vector<1x1x8x8xbf16>,
    %63 = vector.extract_strided_slice %7 {offsets = [0, 88], sizes = [8, 8], strides = [1, 1]} : vector<8x96xf32> to vector<8x8xf32>
    %64 = arith.truncf %63 : vector<8x8xf32> to vector<8x8xbf16>
    %c0_47 = arith.constant 0 : index
    %c3_48 = arith.constant 3 : index
    %c0_49 = arith.constant 0 : index
    %c0_50 = arith.constant 0 : index
    %65 = vector.load %arg7[%c0_47, %c3_48, %c0_49, %c0_50] : memref<1x4x8x8xbf16, #tpu.memory_space<vmem>>, vector<1x1x8x8xbf16>
    %66 = vector.shape_cast %65 : vector<1x1x8x8xbf16> to vector<8x8xbf16>
    %67 = vector.shape_cast %64 : vector<8x8xbf16> to vector<1x1x8x8xbf16>
    tpu.vector_store %arg7[%c0_47, %c3_48, %c0_49, %c0_50], %67 {strides = array<i32>} : memref<1x4x8x8xbf16, #tpu.memory_space<vmem>>, vector<1x1x8x8xbf16>,
    return
  }
  func.func @transform_0(%arg0: i32, %arg1: i32) -> (i32, i32, i32) {
    %c0_i32 = arith.constant 0 : i32
    %c0_i32_0 = arith.constant 0 : i32
    return %arg0, %arg1, %c0_i32 : i32, i32, i32
  }
  func.func @transform_1(%arg0: i32, %arg1: i32) -> (i32, i32) {
    %c0_i32 = arith.constant 0 : i32
    %c0_i32_0 = arith.constant 0 : i32
    %c0_i32_1 = arith.constant 0 : i32
    return %c0_i32, %c0_i32_0 : i32, i32
  }
  func.func @transform_2(%arg0: i32, %arg1: i32) -> (i32, i32) {
    %c0_i32 = arith.constant 0 : i32
    %c0_i32_0 = arith.constant 0 : i32
    %c0_i32_1 = arith.constant 0 : i32
    return %c0_i32, %c0_i32_0 : i32, i32
  }
  func.func @transform_3(%arg0: i32, %arg1: i32) -> (i32, i32, i32, i32) {
    %c0_i32 = arith.constant 0 : i32
    %c0_i32_0 = arith.constant 0 : i32
    %c0_i32_1 = arith.constant 0 : i32
    return %arg0, %c0_i32, %arg1, %c0_i32_0 : i32, i32, i32, i32
  }
  func.func @transform_4(%arg0: i32, %arg1: i32) -> (i32, i32, i32, i32) {
    %c0_i32 = arith.constant 0 : i32
    %c0_i32_0 = arith.constant 0 : i32
    %c0_i32_1 = arith.constant 0 : i32
    return %arg0, %c0_i32, %arg1, %c0_i32_0 : i32, i32, i32, i32
  }
  func.func @transform_5(%arg0: i32, %arg1: i32) -> (i32, i32, i32, i32) {
    %c0_i32 = arith.constant 0 : i32
    %c0_i32_0 = arith.constant 0 : i32
    %c0_i32_1 = arith.constant 0 : i32
    return %arg0, %c0_i32, %arg1, %c0_i32_0 : i32, i32, i32, i32
  }
}

</mosaic_0001>

<bundles_post_ra>
// kernel: tpu_custom_call.1
= control target key start
LH: loop header
LB: loop body
LE: loop exit
PB: predicated region body
PF: predicated region fallthrough
CT: control target
= control target key end

     0   :  { %11 = vsyncpa [#allocation3], 0  ;;  %s1381_s0 = inlined_call_operand.hbm [shape: f32[2,8,32], index: 0, kind: input, shape index: {}]   ;;  %s1382_s1 = inlined_call_operand.hbm [shape: bf16[32,96], index: 1, kind: input, shape index: {}]   ;;  %s1383_s2 = inlined_call_operand.vmem [shape: f32[1,96], index: 2, kind: input, shape index: {}]   ;;  %s1384_s3 = inlined_call_operand.hbm [shape: bf16[2,4,8,8], index: 3, kind: output, shape index: {0}]   ;;  %s1385_s4 = inlined_call_operand.hbm [shape: bf16[2,4,8,8], index: 4, kind: output, shape index: {1}]   ;;  %s1386_s5 = inlined_call_operand.hbm [shape: bf16[2,4,8,8], index: 5, kind: output, shape index: {2}]  }
   0x1   :  { %13 = vsyncpa [#allocation3 + $0x1], 0 }
   0x2   :  { %14 = vsyncpa [#allocation6], 0 }
   0x3   :  { %15 = vsyncpa [#allocation4], 0 }
   0x4   :  { %17 = vsyncpa [#allocation4 + $0x1], 0 }
   0x5   :  { %18 = vsyncpa [#allocation9], 0 }
   0x6   :  { %20 = vsyncpa [#allocation9 + $0x1], 0  ;;  %s1052_s18 = smov 0   ;;  %s1054_s19 = smov 0  }
   0x7   :  { %s1056_s20 = smov 0   ;;  %s1058_s21 = smov 0  }
   0x8   :  { %s1060_s22 = smov 0   ;;  %s1062_s23 = smov 0  }
   0x9 LB: > { %s1083_s24 = sadd.s32 4294967295, %s999_s23   ;;  %s1390_s25 = sadd.s32 4294967294, %s999_s23   ;;  %s999_s23 = sphi %s1062_s23, %s26_s23   ;;  %s995_s22 = sphi %s1060_s22, %s1412_s22   ;;  %s991_s21 = sphi %s1058_s21, %s1411_s21   ;;  %s987_s20 = sphi %s1056_s20, %s1410_s20   ;;  %s983_s19 = sphi %s1054_s19, %s1409_s19   ;;  %s979_s18 = sphi %s1052_s18, %s1408_s18  }
   0xa   : > { %p60_p0 = scmp.ne.s32.totalorder %s983_s19, %s979_s18  ;;  %p1387_p1 = scmp.eq.s32.totalorder %s1083_s24, 0 }
   0xb   : > { %p134_p3 = scmp.eq.s32.totalorder %s1390_s25, 1  ;;  %p643_p5 = scmp.ge.s32.totalorder %s999_s23, 1 }
   0xc   : > { %p1094_p4 = por %p1387_p1, %p60_p0  ;;  %p197_p7 = scmp.lt.s32.totalorder %s999_s23, 3 }
   0xd   : > { %p1099_p6 = por %p134_p3, %p60_p0  ;;  %s1001_s29 = smov [#allocation5]  }
   0xe   : > { %s1391_s26 = scalar_select %p1094_p4, 1, 0 }
   0xf   : > { %s1392_s27 = scalar_select %p1099_p6, 1, 0 }
  0x10   : > { %p1104_p8 = pnand %p643_p5, %p197_p7  ;;  %s209_s30 = sshll.u32 %s1001_s29, 4  ;;  %s210_s30 = int_to_ptr.vmem [resolvable:$true] %s209_s30 }
  0x11   : > { %s38_s7 = sadd.s32 1, %s995_s22  ;;  %s795_s10 = scalar_lea.hbm %s1382_s1, 256 }
  0x12   : > { %s1393_s28 = scalar_select %p1104_p8, 1, 0 }
  0x13   : > { %p706_p9 = pneg %p1104_p8  ;;  %p796_p12 = scmp.ne.s32.totalorder %s1382_s1, %s795_s10 }
  0x14   : > { %p802_p5 = scmp.lt.u32.totalorder %s795_s10, %s1382_s1 }
  0x15   : > { %p1113_p11 = pnand %p706_p9, %p1387_p1 }
  0x17   : > { %p797_p13 = pneg %p1113_p11 }
  0x19   : > { %p798_p0 = pnand %p797_p13, %p796_p12 }
  0x1b   : > { %p799_p3 = pneg %p798_p0 }
  0x1d   : > { %p804_p7 = pnand %p802_p5, %p799_p3 }
  0x1f   : > { %807 = shalt.err (!%p804_p7)
}
  0x20   : > { %s808_s15 = scalar_lea.vmem %s210_s30, 256  ;;  %p816_p2 = scmp.lt.s32.totalorder %s210_s30, %s210_s30 }
  0x21   : > { %p809_p9 = scmp.ne.s32.totalorder %s210_s30, %s808_s15  ;;  %p817_p6 = scmp.lt.s32.totalorder %s808_s15, %s808_s15 }
  0x23   : > { %p811_p10 = pnand %p809_p9, %p797_p13  ;;  %p818_p4 = por %p817_p6, %p816_p2 }
  0x25   : > { %p812_p1 = pneg %p811_p10 }
  0x27   : > { %p819_p8 = pnand %p818_p4, %p812_p1 }
  0x29   : > { %822 = shalt.err (!%p819_p8)
}
  0x2a   : > { %s1002_s16 = smov 64   ;;  %s1003_s17 = smov 4  }
  0x2b   : > { %709 = dma.hbm_to_vmem [thread:$0]  (!%p1113_p11), %s1382_s1, 256, %s210_s30, [#allocation6], %s1002_s16, %s1002_s16, %s1003_s17  }
  0x2c   : > { %p40_p1 = scmp.ge.s32.totalorder %s38_s7, 2  ;;  %s47_s9 = sadd.s32 1, %s987_s20 }
  0x2d   : > { %p54_p2 = scmp.ne.s32.totalorder %s987_s20, %s983_s19  ;;  %p55_p4 = scmp.eq.s32.totalorder %s999_s23, 0 }
  0x2e   : > { %s1414_s7 = smov (%p40_p1, %s38_s7), 0  ;;  %p1396_p8 = scmp.eq.s32.totalorder %s1083_s24, 1 }
  0x2f   : > { %p1140_p6 = por %p55_p4, %p54_p2  ;;  %s42_s6 = ssub.s32 %s995_s22, %s1414_s7 }
  0x30   : > { %p1146_p10 = por %p1396_p8, %p54_p2  ;;  %p725_p12 = scmp.lt.s32.totalorder %s999_s23, 2 }
  0x31   : > { %p45_p11 = scmp.eq.s32.totalorder %s42_s6, 0  ;;  %s226_s30 = sand.u32 1, %s987_s20  }
  0x32   : > { %s646_s12 = sshll.u32 %s226_s30, 3  ;;  %s647_s14 = sshll.u32 %s995_s22, 7 }
  0x33   : > { %s1155_s13 = scalar_select %p45_p11, %s987_s20, %s47_s9  }
  0x34   : > { %s1161_s17 = scalar_lea.hbm %s1381_s0, %s647_s14  ;;  %s230_s29 = scalar_lea.vmem [#allocation2], %s646_s12 }
  0x35   : > { %s238_s8 = sshll.u32 %s230_s29, 4  ;;  %p1167_p13 = pnand %p725_p12, %p1140_p6  ;;  %s1163_s8 = int_to_ptr.vmem [resolvable:$true] %s238_s8 }
  0x36   : > { %s227_s9 = scalar_lea.sflag [#allocation3], %s226_s30  ;;  %s823_s25 = scalar_lea.hbm %s1161_s17, 128 }
  0x37   : > { %p824_p0 = scmp.ne.s32.totalorder %s1161_s17, %s823_s25  ;;  %p825_p3 = pneg %p1167_p13 }
  0x38   : > { %s828_s15 = scalar_lea.hbm %s1381_s0, 256  ;;  %p829_p9 = scmp.lt.u32.totalorder %s1161_s17, %s1381_s0 }
  0x39   : > { %p826_p5 = pnand %p825_p3, %p824_p0  ;;  %p830_p1 = scmp.lt.u32.totalorder %s828_s15, %s823_s25 }
  0x3a   : > { %p832_p4 = scmp.lt.u32.totalorder %s823_s25, %s1161_s17 }
  0x3b   : > { %p827_p7 = pneg %p826_p5  ;;  %p831_p2 = por %p830_p1, %p829_p9 }
  0x3d   : > { %p833_p6 = por %p832_p4, %p831_p2 }
  0x3f   : > { %p834_p8 = pnand %p833_p6, %p827_p7 }
  0x41   : > { %837 = shalt.err (!%p834_p8)
}
  0x42   : > { %s838_s30 = scalar_lea.vmem %s1163_s8, 128  ;;  %s1004_s29 = smov [#allocation2]  }
  0x43   : > { %p839_p12 = scmp.ne.s32.totalorder %s1163_s8, %s838_s30  ;;  %s843_s12 = sshll.u32 %s1004_s29, 4  ;;  %s844_s12 = int_to_ptr.vmem [resolvable:$false] %s843_s12 }
  0x44   : > { %s845_s14 = scalar_lea.vmem %s844_s12, 256  ;;  %p846_p5 = scmp.lt.s32.totalorder %s1163_s8, %s844_s12 }
  0x45   : > { %p841_p11 = pnand %p839_p12, %p825_p3  ;;  %p847_p9 = scmp.lt.s32.totalorder %s845_s14, %s838_s30 }
  0x47   : > { %p842_p0 = pneg %p841_p11  ;;  %p848_p1 = por %p847_p9, %p846_p5 }
  0x49   : > { %p849_p2 = pnand %p848_p1, %p842_p0 }
  0x4b   : > { %852 = shalt.err (!%p849_p2)
}
  0x4c   : > { %713 = dma.hbm_to_vmem [thread:$0]  (!%p1167_p13), %s1161_s17, 128, %s1163_s8, %s227_s9  }
  0x4d   : > { %p1399_p7 = scmp.ne.s32.totalorder %s1393_s28, 0 }
  0x4e   : > { %s1199_s25 = sand.u32 (!%p1399_p7), 1, %s983_s19   ;;  %p1400_p3 = scmp.ne.s32.totalorder (!%p1399_p7), %s1391_s26, 0 }
  0x4f   : > { %247 = sbr.rel (%p1399_p7) target bundleno = 496 (0x1f0), region = 32  ;;  %s649_s15 = sshll.u32 (!%p1399_p7), %s1199_s25, 3 }
  0x50   : > { %s250_s10 = scalar_lea.sflag (!%p1399_p7), [#allocation3], %s1199_s25  ;;  %s253_s16 = scalar_lea.vmem (!%p1399_p7), [#allocation2], %s649_s15 }
  0x56   : > { %962 = dma.done.wait (%p1400_p3), %s250_s10, 128  }
  0x57   : > { %964 = vsyncadd (%p1400_p3), %s250_s10, 4294967168  ;;  %p1401_p4 = scmp.eq.s32.totalorder %s1083_s24, 0 }
  0x59   : > { %966 = dma.done.wait (%p1401_p4), [#allocation6], 256   ;;  %p1402_p13 = pmov %p1401_p4 }
  0x5a   : > { %v1005_v0 = vmov 0.0   ;;  %vm1006_vm0 = vmmov 0   ;;  %v793_v1 = vld [vmem:[#allocation5] sm:$0xff]   ;;  %v794_v2 = vld [vmem:[#allocation5 + $0x8] sm:$0xff]   ;;  %v295_v3 = vld [vmem:[%s253_s16] sm:$0xff]  ;;  %vm320_vm1 = vcmask 261120  }
  0x5b   : > { %968 = vsyncadd (%p1402_p13), [#allocation6], 4294967040  ;;  %686 = vmatprep.subr.bf16.mxu0 %v1005_v0  ;;  %690 = vmatprep.mubr.msk.bf16.mxu0 %vm1006_vm0, %v1005_v0  ;;  %v296_v4 = vpack.c.bf16 %v295_v3, %v295_v3  ;;  %v654_v5 = vld [vmem:[%s1383_s2] ss:$0 sm:$0xff]  ;;  %s1215_s17 = sshll.u32 %s1199_s25, 4  ;;  %vm365_vm2 = vcmask 60416  }
  0x5c   : > { %687 = vmatpush3.bf16.msra.mxu0 %v793_v1  ;;  %s1007_s8 = smov 80   ;;  %s1008_s6 = smov 96  }
  0x5d   : > { %688 = vmatprep.subr.bf16.mxu0 %v1005_v0  ;;  %s1218_s9 = scalar_lea.vmem [#allocation7], %s1215_s17  ;;  %s1009_s30 = smov 72  }
  0x5e   : > { %s1010_s29 = smov 88   ;;  %s1011_s12 = smov 120  }
  0x5f   : > { %s1012_s14 = smov 64   ;;  %s1013_s15 = smov 112  }
  0x60   : > { %689 = vmatpush3.bf16.msra.mxu0 %v794_v2  ;;  %s1014_s10 = smov 56   ;;  %s1015_s16 = smov 104  }
  0x61   : > { %s1016_s26 = smov 48   ;;  %s1017_s28 = smov 40  }
  0x63   : > { %691 = vmatmul.mubr.msk.bf16.vlgmr.msra.gmra.mrb[0].mxu0 %vm320_vm1, %v296_v4 }
 0x136   : > { %v358_v6 = vpop.f32.mrb[0].mxu0 }
 0x137   : > { %v359_v7 = vadd.f32 %v654_v5, %v358_v6  ;;  %v692_v8 = vpop.f32.mrb[1].mxu0 }
 0x138   : > { %v361_v9 = vpop.f32.mrb[2].mxu0 }
 0x139   : > { %v364_v10 = vpack.c.bf16 %v359_v7, %v359_v7  ;;  %v693_v11 = vpop.f32.mrb[3].mxu0 }
 0x13b   : > { %398 = vrot.lane.b32.xlu1 %v364_v10, %s1007_s8  ;;  %370 = vrot.lane.b32.xlu0 %v364_v10, %s1008_s6  ;;  %366 = vst.msk [vmem:[%s1218_s9] sm:$0xf] %vm365_vm2, %v364_v10  ;;  %s286_s8 = scalar_lea.vmem [#allocation8], %s1215_s17 }
 0x13c   : > { %s465_s6 = sshll.u32 %s286_s8, 4  ;;  %s1230_s6 = int_to_ptr.vmem [resolvable:$true] %s465_s6 }
 0x13f   : > { %413 = vrot.lane.b32.xlu1 %v364_v10, %s1009_s30  ;;  %383 = vrot.lane.b32.xlu0 %v364_v10, %s1010_s29  ;;  %s428_s30 = sand.u32 1, %s1083_s24   ;;  %s1226_s29 = sshll.u32 %s991_s21, 8 }
 0x140   : > { %s1240_s21 = scalar_lea.sflag [#allocation9], %s428_s30  ;;  %s853_s24 = scalar_lea.vmem %s1230_s6, 256 }
 0x141   : > { %p854_p6 = scmp.ne.s32.totalorder %s1230_s6, %s853_s24 }
 0x143   : > { %378 = vrot.lane.b32.xlu1 %v364_v10, %s1011_s12  ;;  %374 = vrot.lane.b32.xlu0 %v364_v10, %s1012_s14  ;;  %p855_p8 = pnand %p854_p6, %p1146_p10 }
 0x145   : > { %p856_p12 = pneg %p855_p8 }
 0x147   : > { %393 = vrot.lane.b32.xlu1 %v364_v10, %s1013_s15  ;;  %388 = vrot.lane.b32.xlu0 %v364_v10, %s1014_s10  ;;  %s1236_s10 = scalar_lea.hbm %s1385_s4, %s1226_s29 }
 0x14b   : > { %408 = vrot.lane.b32.xlu1 %v364_v10, %s1015_s16  ;;  %403 = vrot.lane.b32.xlu0 %v364_v10, %s1016_s26  ;;  %s1018_s16 = smov [#allocation8]  }
 0x14c   : > { %s857_s26 = sshll.u32 %s1018_s16, 4  ;;  %s858_s26 = int_to_ptr.vmem [resolvable:$false] %s857_s26 }
 0x14d   : > { %p860_p11 = scmp.lt.s32.totalorder %s1230_s6, %s858_s26 }
 0x14f   : > { %418 = vrot.lane.b32.xlu0 %v364_v10, %s1017_s28  ;;  %s859_s28 = scalar_lea.vmem %s858_s26, 512 }
 0x150   : > { %p861_p0 = scmp.lt.s32.totalorder %s859_s28, %s853_s24 }
 0x152   : > { %p862_p5 = por %p861_p0, %p860_p11 }
 0x154   : > { %p863_p9 = pnand %p862_p5, %p856_p12 }
 0x1ad   : > { %v399_v12 = vpop.permute.xlu1 %398  ;;  %v371_v13 = vpop.permute.xlu0 %370 }
 0x1ae   : > { %663 = vst.msk [vmem:[%s286_s8 + $0x8] sm:$0xf] %vm365_vm2, %v399_v12  ;;  %373 = vst.msk [vmem:[%s286_s8] sm:$0xf] %vm365_vm2, %v371_v13 }
 0x1b1   : > { %v414_v14 = vpop.permute.xlu1 %413  ;;  %v384_v15 = vpop.permute.xlu0 %383 }
 0x1b2   : > { %666 = vst.msk [vmem:[%s286_s8 + $0xc] sm:$0xf] %vm365_vm2, %v414_v14  ;;  %660 = vst.msk [vmem:[%s286_s8 + $0x4] sm:$0xf] %vm365_vm2, %v384_v15 }
 0x1b3   : > { %866 = shalt.err (!%p863_p9)
}
 0x1b4   : > { %s867_s8 = scalar_lea.hbm %s1236_s10, 256  ;;  %s871_s15 = scalar_lea.hbm %s1385_s4, 512 }
 0x1b5   : > { %p868_p1 = scmp.ne.s32.totalorder %s1236_s10, %s867_s8  ;;  %p872_p3 = scmp.lt.u32.totalorder %s1236_s10, %s1385_s4 }
 0x1b6   : > { %p873_p4 = scmp.lt.u32.totalorder %s871_s15, %s867_s8  ;;  %p875_p6 = scmp.lt.u32.totalorder %s867_s8, %s1236_s10 }
 0x1b7   : > { %p869_p2 = pnand %p868_p1, %p1146_p10 }
 0x1b8   : > { %p874_p13 = por %p873_p4, %p872_p3 }
 0x1b9   : > { %p870_p7 = pneg %p869_p2 }
 0x1ba   : > { %p876_p8 = por %p875_p6, %p874_p13 }
 0x1bc   : > { %p877_p12 = pnand %p876_p8, %p870_p7 }
 0x1be   : > { %880 = shalt.err (!%p877_p12)
}
 0x1bf   : > { %s1019_s24 = smov 4   ;;  %v379_v16 = vpop.permute.xlu1 %378  ;;  %v375_v17 = vpop.permute.xlu0 %374  ;;  %s1270_s28 = scalar_lea.vmem [#allocation10], %s1215_s17 }
 0x1c0   : > { %701 = dma.vmem_to_hbm [thread:$0]  (%p1146_p10), %s1230_s6, 256, %s1236_s10, %s1240_s21, %s1012_s14, %s1012_s14, %s1019_s24  }
 0x1c1   : > { %659 = vst.msk [vmem:[%s1218_s9 + $0x4] sm:$0xf] %vm365_vm2, %v379_v16  ;;  %377 = vst.msk [vmem:[%s1270_s28] sm:$0xf] %vm365_vm2, %v375_v17  ;;  %s448_s8 = sshll.u32 %s1218_s9, 4  ;;  %s1285_s17 = scalar_lea.hbm %s1384_s3, %s1226_s29  ;;  %s1279_s8 = int_to_ptr.vmem [resolvable:$true] %s448_s8 }
 0x1c2   : > { %s881_s15 = scalar_lea.vmem %s1279_s8, 256  ;;  %s1020_s16 = smov [#allocation7]  }
 0x1c3   : > { %v394_v18 = vpop.permute.xlu1 %393  ;;  %v389_v19 = vpop.permute.xlu0 %388  ;;  %p882_p11 = scmp.ne.s32.totalorder %s1279_s8, %s881_s15  ;;  %s885_s26 = sshll.u32 %s1020_s16, 4  ;;  %s886_s26 = int_to_ptr.vmem [resolvable:$false] %s885_s26 }
 0x1c4   : > { %662 = vst.msk [vmem:[%s1218_s9 + $0x8] sm:$0xf] %vm365_vm2, %v394_v18  ;;  %661 = vst.msk [vmem:[%s1270_s28 + $0x4] sm:$0xf] %vm365_vm2, %v389_v19  ;;  %s887_s6 = scalar_lea.vmem %s886_s26, 512  ;;  %p888_p9 = scmp.lt.s32.totalorder %s1279_s8, %s886_s26 }
 0x1c5   : > { %p883_p0 = pnand %p882_p11, %p1146_p10  ;;  %p889_p1 = scmp.lt.s32.totalorder %s887_s6, %s881_s15 }
 0x1c7   : > { %v409_v20 = vpop.permute.xlu1 %408  ;;  %v404_v21 = vpop.permute.xlu0 %403  ;;  %p884_p5 = pneg %p883_p0  ;;  %p890_p2 = por %p889_p1, %p888_p9 }
 0x1c8   : > { %665 = vst.msk [vmem:[%s1218_s9 + $0xc] sm:$0xf] %vm365_vm2, %v409_v20  ;;  %664 = vst.msk [vmem:[%s1270_s28 + $0x8] sm:$0xf] %vm365_vm2, %v404_v21 }
 0x1c9   : > { %p891_p7 = pnand %p890_p2, %p884_p5 }
 0x1cb   : > { %894 = shalt.err (!%p891_p7)
}
 0x1cc   : > { %s895_s9 = scalar_lea.hbm %s1285_s17, 256  ;;  %s899_s16 = scalar_lea.hbm %s1384_s3, 512 }
 0x1cd   : > { %p896_p3 = scmp.ne.s32.totalorder %s1285_s17, %s895_s9  ;;  %p900_p6 = scmp.lt.u32.totalorder %s1285_s17, %s1384_s3 }
 0x1ce   : > { %p901_p8 = scmp.lt.u32.totalorder %s899_s16, %s895_s9  ;;  %p903_p11 = scmp.lt.u32.totalorder %s895_s9, %s1285_s17 }
 0x1cf   : > { %p897_p4 = pnand %p896_p3, %p1146_p10 }
 0x1d0   : > { %p902_p12 = por %p901_p8, %p900_p6 }
 0x1d1   : > { %p898_p13 = pneg %p897_p4 }
 0x1d2   : > { %p904_p0 = por %p903_p11, %p902_p12 }
 0x1d4   : > { %p905_p5 = pnand %p904_p0, %p898_p13 }
 0x1d6   : > { %908 = shalt.err (!%p905_p5)
}
 0x1d7   : > { %s1403_s15 = scalar_lea.sflag [#allocation4], %s1199_s25  ;;  %s1404_s30 = sshll.u32 %s1270_s28, 4  ;;  %v419_v22 = vpop.permute.xlu0 %418  ;;  %s1321_s30 = int_to_ptr.vmem [resolvable:$true] %s1404_s30 }
 0x1d8   : > { %700 = dma.vmem_to_hbm [thread:$0]  (%p1146_p10), %s1279_s8, 256, %s1285_s17, %s1403_s15, %s1012_s14, %s1012_s14, %s1019_s24  }
 0x1d9   : > { %s1327_s9 = scalar_lea.hbm %s1386_s5, %s1226_s29  ;;  %667 = vst.msk [vmem:[%s1270_s28 + $0xc] sm:$0xf] %vm365_vm2, %v419_v22  ;;  %s909_s25 = scalar_lea.vmem %s1321_s30, 256 }
 0x1da   : > { %p910_p9 = scmp.ne.s32.totalorder %s1321_s30, %s909_s25  ;;  %s1021_s8 = smov [#allocation10]  }
 0x1db   : > { %s913_s17 = sshll.u32 %s1021_s8, 4  ;;  %s914_s17 = int_to_ptr.vmem [resolvable:$false] %s913_s17 }
 0x1dc   : > { %p911_p1 = pnand %p910_p9, %p1146_p10  ;;  %s915_s10 = scalar_lea.vmem %s914_s17, 512 }
 0x1dd   : > { %p916_p7 = scmp.lt.s32.totalorder %s1321_s30, %s914_s17  ;;  %p917_p3 = scmp.lt.s32.totalorder %s915_s10, %s909_s25 }
 0x1de   : > { %p912_p2 = pneg %p911_p1 }
 0x1df   : > { %p918_p4 = por %p917_p3, %p916_p7 }
 0x1e1   : > { %p919_p13 = pnand %p918_p4, %p912_p2 }
 0x1e3   : > { %922 = shalt.err (!%p919_p13)
}
 0x1e4   : > { %s923_s29 = scalar_lea.hbm %s1327_s9, 256  ;;  %s927_s26 = scalar_lea.hbm %s1386_s5, 512 }
 0x1e5   : > { %p924_p6 = scmp.ne.s32.totalorder %s1327_s9, %s923_s29  ;;  %p928_p11 = scmp.lt.u32.totalorder %s1327_s9, %s1386_s5 }
 0x1e6   : > { %p929_p0 = scmp.lt.u32.totalorder %s927_s26, %s923_s29  ;;  %p931_p9 = scmp.lt.u32.totalorder %s923_s29, %s1327_s9 }
 0x1e7   : > { %p925_p8 = pnand %p924_p6, %p1146_p10 }
 0x1e8   : > { %p930_p5 = por %p929_p0, %p928_p11 }
 0x1e9   : > { %p926_p12 = pneg %p925_p8 }
 0x1ea   : > { %p932_p1 = por %p931_p9, %p930_p5 }
 0x1ec   : > { %p933_p2 = pnand %p932_p1, %p926_p12 }
 0x1ee   : > { %936 = shalt.err (!%p933_p2)
}
 0x1ef   : > { %702 = dma.vmem_to_hbm [thread:$0]  (%p1146_p10), %s1321_s30, 256, %s1327_s9, %s1240_s21, %s1012_s14, %s1012_s14, %s1019_s24  }
 0x1f0 PF: > { %s497_s6 = sand.u32 1, %s979_s18   ;;  %p1405_p7 = scmp.ne.s32.totalorder %s1392_s27, 0 }
 0x1f1   : > { %p1406_p3 = scmp.ge.s32.totalorder %s999_s23, 2  ;;  %s498_s25 = scalar_lea.sflag [#allocation4], %s497_s6 }
 0x1f3   : > { %p715_p4 = pnand %p1406_p3, %p1405_p7 }
 0x1f5   : > { %970 = dma.done.wait (!%p715_p4), %s498_s25, 256  }
 0x1f6   : > { %972 = vsyncadd (!%p715_p4), %s498_s25, 4294967040  ;;  %s1407_s11 = sadd.s32 4294967294, %s999_s23  }
 0x1f7   : > { %s506_s8 = sand.u32 1, %s1407_s11  }
 0x1f8   : > { %s507_s17 = scalar_lea.sflag [#allocation9], %s506_s8 }
 0x1f9   : > { %974 = dma.done.wait (!%p715_p4), %s507_s17, 512  }
 0x1fa   : > { %976 = vsyncadd (!%p715_p4), %s507_s17, 4294966784  ;;  %s26_s23 = sadd.s32 1, %s999_s23   ;;  %s1408_s18 = smov %s983_s19 }
 0x1fb   : > { %p23_p10 = scmp.ge.s32.totalorder %s26_s23, 4   ;;  %s1409_s19 = smov %s987_s20 }
 0x1fc   : > { %s1410_s20 = smov %s1155_s13  ;;  %s1411_s21 = smov %s995_s22 }
 0x1fd   : > { %s1412_s22 = smov %s1414_s7  ;;  %25 = sbr.rel (!%p23_p10) target bundleno = 9 (0x9), region = 122 }
 0x204   :  { %521 = vsyncpa [#allocation3], 1 }
 0x205   :  { %523 = vsyncpa [#allocation3 + $0x1], 1 }
 0x206   :  { %524 = vsyncpa [#allocation6], 1 }
 0x207   :  { %525 = vsyncpa [#allocation4], 1 }
 0x208   :  { %527 = vsyncpa [#allocation4 + $0x1], 1 }
 0x209   :  { %528 = vsyncpa [#allocation9], 1 }
 0x20a   :  { %530 = vsyncpa [#allocation9 + $0x1], 1 }

</bundles_post_ra>
